<compile_context>
chip_gen: v7x
topology: tpu7x:2x2x1
jax: 0.10.0
libtpu: 0.0.40
codegen_flags: <defaults>
</compile_context>

<pallas_src>
import functools

import jax
import jax.numpy as jnp
import numpy as np
from jax.experimental import pallas as pl
from jax.experimental.pallas import tpu as pltpu
from jax.scipy.linalg import block_diag

EPS = 1e-3  # BatchNorm eps used in DPN's BnActConv blocks (inference mode)


# ----------------------------------------------------------------------------
# Fused kernel:
#   (BN+ReLU+1x1) -> (BN+ReLU+grouped 3-tap conv) -> (BN+ReLU+1x1)
#   (+ optional 1x1 projection path) + residual/dense epilogue,
# all on one batch-aligned (TM, C) channels-last row tile.
# ----------------------------------------------------------------------------
def _dpn_fused_kernel(C2, num_1x1_c, inc, has_proj, *refs):
    if has_proj:
        (x1_ref, x2_ref, edge_ref,
         sa1_ref, ba1_ref, sa2_ref, ba2_ref, wa1_ref, wa2_ref,
         bb_ref, wp_ref, wm_ref, wn_ref, bc_ref, wc_ref,
         ss1_ref, bs1_ref, ss2_ref, bs2_ref, ws1_ref, ws2_ref,
         resid_ref, dense_ref) = refs
    else:
        (x1_ref, x2_ref, edge_ref,
         sa1_ref, ba1_ref, sa2_ref, ba2_ref, wa1_ref, wa2_ref,
         bb_ref, wp_ref, wm_ref, wn_ref, bc_ref, wc_ref,
         resid_ref, dense_ref) = refs

    dot_dt = wa1_ref.dtype                 # bf16 by default (f32 accumulation)
    x1 = x1_ref[...]                       # (M, C1) f32, residual-path channels
    x2 = x2_ref[...]                       # (M, C2) f32, dense-path channels
    M = x1.shape[0]

    def mm(act, w_ref):
        # MXU matmul with bf16 operands, f32 accumulation.
        return jnp.dot(act.astype(dot_dt), w_ref[...],
                       preferred_element_type=jnp.float32)

    # ---- a: BN + ReLU + 1x1 conv, split over the x1|x2 channel groups so the
    #      wrapper never materializes cat([x1, x2]).  Stage-b BN scale is
    #      already folded into wa's output columns.
    y1 = jnp.maximum(x1 * sa1_ref[...] + ba1_ref[...], 0.0)
    y2 = jnp.maximum(x2 * sa2_ref[...] + ba2_ref[...], 0.0)
    ha = mm(y1, wa1_ref) + mm(y2, wa2_ref)                       # (M, Ca) f32

    # ---- b: BN (scale pre-folded) + ReLU + grouped 3-tap conv expressed as
    #      three accumulating block-diagonal matmuls over sublane-shifted rows
    #      (no (M, 3*Ca) concat).  edge_ref holds per-row keep masks for the
    #      per-sample zero padding (tiles are whole sequences, so row index
    #      within the tile == position l).
    yb = jnp.maximum(ha + bb_ref[...], 0.0)
    keep_prev = edge_ref[:, 0:1]                                 # 0.0 where l == 0
    keep_next = edge_ref[:, 1:2]                                 # 0.0 where l == L-1
    y_prev = pltpu.roll(yb, shift=1, axis=0) * keep_prev         # y[l-1] (XLU shift)
    y_next = pltpu.roll(yb, shift=M - 1, axis=0) * keep_next     # y[l+1]
    hb = mm(yb, wm_ref) + mm(y_prev, wp_ref) + mm(y_next, wn_ref)  # (M, Cb) f32

    # ---- c: BN (scale pre-folded) + ReLU + 1x1 conv.
    yc = jnp.maximum(hb + bc_ref[...], 0.0)
    out = mm(yc, wc_ref)                                         # (M, Cc) f32
    out1 = out[:, :num_1x1_c]
    out2 = out[:, num_1x1_c:]

    # ---- fused epilogue (residual add / proj split / dense concat) ----
    if has_proj:
        ys1 = jnp.maximum(x1 * ss1_ref[...] + bs1_ref[...], 0.0)
        ys2 = jnp.maximum(x2 * ss2_ref[...] + bs2_ref[...], 0.0)
        xs = mm(ys1, ws1_ref) + mm(ys2, ws2_ref)                 # (M, Cc)
        resid_ref[...] = xs[:, :num_1x1_c] + out1
        dense_ref[:, :inc] = xs[:, num_1x1_c:]
        dense_ref[:, inc:] = out2
    else:
        resid_ref[...] = x1 + out1
        dense_ref[:, :C2] = x2
        dense_ref[:, C2:] = out2


# ----------------------------------------------------------------------------
# Tiling / VMEM helpers
# ----------------------------------------------------------------------------
def _pick_batch_tile(B, L, target_rows=1024, min_grid=4):
    """Batch items per grid step (tile = TB whole sequences = TB*L rows).

    Keeps tiles batch-aligned (required by the 3-tap shift masking), respects
    the sublane-8 block constraint, prefers an even grid of >= min_grid steps
    (>= 2 iterations per TensorCore on v7x so the pipeline stays filled), and
    then maximizes tile size up to ~target_rows rows.
    """
    divisors = [d for d in range(1, B + 1) if B % d == 0]
    valid = [d for d in divisors if (d * L) % 8 == 0 or d == B]
    tiers = [
        [d for d in valid if (B // d) >= min_grid and (B // d) % 2 == 0],
        [d for d in valid if (B // d) >= 2],
        valid,
    ]
    cands = next(t for t in tiers if t)
    fitting = [d for d in cands if d * L <= target_rows]
    return max(fitting) if fitting else min(cands)


def _vmem_limit_bytes(TM, C1, C2, Ca, Cb, Cc, Cr, Cd, has_proj, dot_bytes=2):
    """Scoped-VMEM budget derived from the real footprint, capped at v7x's 64 MiB."""
    f32 = 4
    io = 2 * TM * (C1 + C2 + Cr + Cd) * f32            # double-buffered row tiles
    w_elems = (C1 + C2) * Ca + 3 * Ca * Cb + Cb * Cc
    if has_proj:
        w_elems += (C1 + C2) * Cc
    weights = 2 * w_elems * dot_bytes                   # default double-buffered
    consts = 2 * (2 * TM + 4 * (C1 + C2) + Ca + Cb) * f32
    live = TM * (4 * Ca + 2 * Cb + 2 * Cc) * f32        # rough live intermediates
    need = io + weights + consts + live
    return int(min(64 << 20, max(16 << 20, 2 * need + (4 << 20))))


# ----------------------------------------------------------------------------
# Channels-last forward: zero XLA data movement outside the kernel.
#   x1_cl: (B, L, C1)  residual-path input   x2_cl: (B, L, C2)  dense-path input
# Returns resid (B, L, num_1x1_c) and dense (B, L, Cd), channels-last.
# ----------------------------------------------------------------------------
def dual_path_block_forward_cl(params, x1_cl, x2_cl, *, num_1x1_c, inc,
                               block_type="normal"):
    assert block_type in ("normal", "proj")
    has_proj = block_type == "proj"
    B, L, C1 = x1_cl.shape
    C2 = x2_cl.shape[-1]
    Ca = params["wa1"].shape[1]
    Cb = params["wm"].shape[1]
    Cc = params["wc"].shape[1]
    assert Cc == num_1x1_c + inc
    if not has_proj:
        assert C1 == num_1x1_c, "residual path needs x[0] channels == num_1x1_c"
    Cr = num_1x1_c
    Cd = (2 * inc) if has_proj else (C2 + inc)

    TB = _pick_batch_tile(B, L)
    TM = TB * L
    grid = (B // TB,)

    x1_2d = x1_cl.reshape(B * L, C1)        # metadata-only reshapes
    x2_2d = x2_cl.reshape(B * L, C2)

    # Host-precomputed keep masks for the conv's per-sample zero padding.
    l_idx = np.arange(TM) % L
    edge = jnp.asarray(
        np.stack([(l_idx != 0), (l_idx != L - 1)], axis=1).astype(np.float32))

    def row_spec(c):
        return pl.BlockSpec((TM, c), lambda i: (i, 0))

    def const_spec(shape):
        return pl.BlockSpec(shape, lambda i: (0, 0))

    ins = [x1_2d, x2_2d, edge,
           params["sa1"], params["ba1"], params["sa2"], params["ba2"],
           params["wa1"], params["wa2"],
           params["bb"], params["wp"], params["wm"], params["wn"],
           params["bc"], params["wc"]]
    in_specs = [row_spec(C1), row_spec(C2), const_spec((TM, 2)),
                const_spec((1, C1)), const_spec((1, C1)),
                const_spec((1, C2)), const_spec((1, C2)),
                const_spec((C1, Ca)), const_spec((C2, Ca)),
                const_spec((1, Ca)),
                const_spec((Ca, Cb)), const_spec((Ca, Cb)), const_spec((Ca, Cb)),
                const_spec((1, Cb)), const_spec((Cb, Cc))]
    if has_proj:
        ins += [params["ss1"], params["bs1"], params["ss2"], params["bs2"],
                params["ws1"], params["ws2"]]
        in_specs += [const_spec((1, C1)), const_spec((1, C1)),
                     const_spec((1, C2)), const_spec((1, C2)),
                     const_spec((C1, Cc)), const_spec((C2, Cc))]

    out_shape = (jax.ShapeDtypeStruct((B * L, Cr), jnp.float32),
                 jax.ShapeDtypeStruct((B * L, Cd), jnp.float32))
    out_specs = (row_spec(Cr), row_spec(Cd))

    kernel = functools.partial(_dpn_fused_kernel, C2, num_1x1_c, inc, has_proj)
    resid2d, dense2d = pl.pallas_call(
        kernel,
        out_shape=out_shape,
        grid=grid,
        in_specs=in_specs,
        out_specs=out_specs,
        compiler_params=pltpu.CompilerParams(
            dimension_semantics=("parallel",),
            vmem_limit_bytes=_vmem_limit_bytes(
                TM, C1, C2, Ca, Cb, Cc, Cr, Cd, has_proj)),
    )(*ins)
    return resid2d.reshape(B, L, Cr), dense2d.reshape(B, L, Cd)


def dual_path_block_forward(params, x_tuple, *, num_1x1_c, inc,
                            block_type="normal"):
    """Torch-compat NCL adapter.  In a channels-last pipeline, call
    dual_path_block_forward_cl directly and these boundary transposes vanish."""
    x1, x2 = x_tuple                                   # (B, C, L)
    x1_cl = jnp.transpose(x1, (0, 2, 1))
    x2_cl = jnp.transpose(x2, (0, 2, 1))
    r_cl, d_cl = dual_path_block_forward_cl(
        params, x1_cl, x2_cl, num_1x1_c=num_1x1_c, inc=inc,
        block_type=block_type)
    return jnp.transpose(r_cl, (0, 2, 1)), jnp.transpose(d_cl, (0, 2, 1))


# ----------------------------------------------------------------------------
# Parameter construction (torch-shaped "raw" params + kernel-layout params)
# ----------------------------------------------------------------------------
def _init_bn_conv(key, in_chs, out_chs, ksize, groups=1):
    kg, kb, km, kv, kw = jax.random.split(key, 5)
    gamma = jax.random.uniform(kg, (in_chs,), minval=0.5, maxval=1.5, dtype=jnp.float32)
    beta = 0.1 * jax.random.normal(kb, (in_chs,), dtype=jnp.float32)
    mean = 0.1 * jax.random.normal(km, (in_chs,), dtype=jnp.float32)
    var = jax.random.uniform(kv, (in_chs,), minval=0.5, maxval=1.5, dtype=jnp.float32)
    fan_in = (in_chs // groups) * ksize
    w = jax.random.normal(kw, (out_chs, in_chs // groups, ksize),
                          dtype=jnp.float32) / np.sqrt(fan_in)
    scale = gamma / jnp.sqrt(var + EPS)          # folded BN (inference mode)
    bias = beta - mean * scale
    return scale, bias, w                        # w in torch layout (O, I/g, K)


def make_raw_params(key, in_chs, num_1x1_a, num_3x3_b, num_1x1_c, inc, groups,
                    block_type):
    k_a, k_b, k_c, k_s = jax.random.split(key, 4)
    raw = {
        "a": _init_bn_conv(k_a, in_chs, num_1x1_a, 1),
        "b": _init_bn_conv(k_b, num_1x1_a, num_3x3_b, 3, groups=groups),
        "c": _init_bn_conv(k_c, num_3x3_b, num_1x1_c + inc, 1),
    }
    if block_type == "proj":
        raw["s"] = _init_bn_conv(k_s, in_chs, num_1x1_c + inc, 1)
    return raw


def prepare_params(raw, groups, split_c1, dot_dtype=jnp.bfloat16):
    """Torch-shaped params -> fused-kernel layout.

    * 1x1 weights become (Cin, Cout) and are split at `split_c1` (= x1 channel
      count) so the kernel consumes x1/x2 separately (no wrapper concat).
    * Stage-b BN scale is folded into wa's output columns; stage-c BN scale is
      folded into the block-diagonal tap weights (exact: the fold precedes the
      ReLU argument).  sa / ss cannot be folded (they act on x before ReLU).
    * Matmul weights are stored in bf16 (f32 accumulation in the kernel).
    """
    sa, ba, wa = raw["a"]                      # wa: (Ca, Cin, 1)
    sb, bb, wb = raw["b"]                      # wb: (Cb, Ca//g, 3)
    sc, bc, wc = raw["c"]                      # wc: (Cc, Cb, 1)

    wa2d = wa[:, :, 0].T * sb[None, :]         # (Cin, Ca), sb folded
    Cb_, Cgi, _ = wb.shape
    Cgo = Cb_ // groups
    taps = []
    for t in range(3):
        blocks = [wb[g * Cgo:(g + 1) * Cgo, :, t].T for g in range(groups)]
        taps.append(block_diag(*blocks) * sc[None, :])   # (Ca, Cb), sc folded
    wc2d = wc[:, :, 0].T                                  # (Cb, Cc)

    p = {
        "sa1": sa[:split_c1].reshape(1, -1), "ba1": ba[:split_c1].reshape(1, -1),
        "sa2": sa[split_c1:].reshape(1, -1), "ba2": ba[split_c1:].reshape(1, -1),
        "wa1": wa2d[:split_c1].astype(dot_dtype),
        "wa2": wa2d[split_c1:].astype(dot_dtype),
        "bb": bb.reshape(1, -1),
        "wp": taps[0].astype(dot_dtype),
        "wm": taps[1].astype(dot_dtype),
        "wn": taps[2].astype(dot_dtype),
        "bc": bc.reshape(1, -1),
        "wc": wc2d.astype(dot_dtype),
    }
    if "s" in raw:
        ss, bs, ws = raw["s"]
        ws2d = ws[:, :, 0].T
        p.update({
            "ss1": ss[:split_c1].reshape(1, -1), "bs1": bs[:split_c1].reshape(1, -1),
            "ss2": ss[split_c1:].reshape(1, -1), "bs2": bs[split_c1:].reshape(1, -1),
            "ws1": ws2d[:split_c1].astype(dot_dtype),
            "ws2": ws2d[split_c1:].astype(dot_dtype),
        })
    return p


# ----------------------------------------------------------------------------
# Pure-JAX reference (mirrors the PyTorch forward) for a correctness check
# ----------------------------------------------------------------------------
def _ref_bn_act(x_ncl, scale, bias):
    return jnp.maximum(x_ncl * scale[None, :, None] + bias[None, :, None], 0.0)


def _ref_conv1d(x_ncl, w, padding=0, groups=1):
    return jax.lax.conv_general_dilated(
        x_ncl, w, window_strides=(1,), padding=[(padding, padding)],
        dimension_numbers=("NCH", "OIH", "NCH"), feature_group_count=groups,
        precision=jax.lax.Precision.HIGHEST)


def reference_forward(raw, x_tuple, *, num_1x1_c, groups, block_type="normal"):
    x1, x2 = x_tuple
    x_in = jnp.concatenate([x1, x2], axis=1)
    if block_type == "proj":
        ss, bs, ws = raw["s"]
        xs = _ref_conv1d(_ref_bn_act(x_in, ss, bs), ws)
        x_s1, x_s2 = xs[:, :num_1x1_c, :], xs[:, num_1x1_c:, :]
    else:
        x_s1, x_s2 = x1, x2
    sa, ba, wa = raw["a"]
    h = _ref_conv1d(_ref_bn_act(x_in, sa, ba), wa)
    sb, bb, wb = raw["b"]
    h = _ref_conv1d(_ref_bn_act(h, sb, bb), wb, padding=1, groups=groups)
    sc, bc, wc = raw["c"]
    h = _ref_conv1d(_ref_bn_act(h, sc, bc), wc)
    out1 = h[:, :num_1x1_c, :]
    out2 = h[:, num_1x1_c:, :]
    return x_s1 + out1, jnp.concatenate([x_s2, out2], axis=1)


if __name__ == "__main__":
    # Small DPN-like config: in_chs = 48 (x1: 32 ch residual, x2: 16 ch dense)
    B, L = 8, 16
    num_1x1_a, num_3x3_b, num_1x1_c, inc, groups = 32, 32, 32, 16, 4
    in_chs = 48

    key = jax.random.PRNGKey(0)
    kx1, kx2, kp = jax.random.split(key, 3)
    x1 = jax.random.normal(kx1, (B, num_1x1_c, L), dtype=jnp.float32)          # torch NCL
    x2 = jax.random.normal(kx2, (B, in_chs - num_1x1_c, L), dtype=jnp.float32)

    for block_type in ("normal", "proj"):
        raw = make_raw_params(kp, in_chs, num_1x1_a, num_3x3_b, num_1x1_c, inc,
                              groups, block_type)
        params = prepare_params(raw, groups, split_c1=num_1x1_c)

        resid, dense = dual_path_block_forward(
            params, (x1, x2), num_1x1_c=num_1x1_c, inc=inc,
            block_type=block_type)
        resid = jax.block_until_ready(resid)
        dense = jax.block_until_ready(dense)

        ref_resid, ref_dense = reference_forward(
            raw, (x1, x2), num_1x1_c=num_1x1_c, groups=groups,
            block_type=block_type)

        # Tolerance reflects bf16 MXU operands vs the HIGHEST-precision f32 reference.
        np.testing.assert_allclose(np.asarray(resid), np.asarray(ref_resid),
                                   rtol=2e-2, atol=2e-2)
        np.testing.assert_allclose(np.asarray(dense), np.asarray(ref_dense),
                                   rtol=2e-2, atol=2e-2)
        assert resid.shape == ref_resid.shape
        assert dense.shape == ref_dense.shape

    print("KERNEL_OK")
</pallas_src>

<mosaic_0001>
module attributes {stable_mosaic.version = 11 : i64} {
  func.func @_dpn_fused_kernel(%arg0: i32, %arg1: memref<32x32xf32, #tpu.memory_space<vmem>>, %arg2: memref<32x16xf32, #tpu.memory_space<vmem>>, %arg3: memref<32x2xf32, #tpu.memory_space<vmem>>, %arg4: memref<1x32xf32, #tpu.memory_space<vmem>>, %arg5: memref<1x32xf32, #tpu.memory_space<vmem>>, %arg6: memref<1x16xf32, #tpu.memory_space<vmem>>, %arg7: memref<1x16xf32, #tpu.memory_space<vmem>>, %arg8: memref<32x32xbf16, #tpu.memory_space<vmem>>, %arg9: memref<16x32xbf16, #tpu.memory_space<vmem>>, %arg10: memref<1x32xf32, #tpu.memory_space<vmem>>, %arg11: memref<32x32xbf16, #tpu.memory_space<vmem>>, %arg12: memref<32x32xbf16, #tpu.memory_space<vmem>>, %arg13: memref<32x32xbf16, #tpu.memory_space<vmem>>, %arg14: memref<1x32xf32, #tpu.memory_space<vmem>>, %arg15: memref<32x48xbf16, #tpu.memory_space<vmem>>, %arg16: memref<32x32xf32, #tpu.memory_space<vmem>>, %arg17: memref<32x32xf32, #tpu.memory_space<vmem>>) attributes {dimension_semantics = [#tpu.dimension_semantics<parallel>], iteration_bounds = array<i64: 4>, scalar_prefetch = 0 : i64, scratch_operands = 0 : i64, tpu.core_type = #tpu.core_type<tc>, window_params = [{transform_indices = @transform_0, window_bounds = array<i64: 32, 32>}, {transform_indices = @transform_1, window_bounds = array<i64: 32, 16>}, {pipeline_mode = #tpu.pipeline_mode<synchronous>, transform_indices = @transform_2, window_bounds = array<i64: 32, 2>}, {pipeline_mode = #tpu.pipeline_mode<synchronous>, transform_indices = @transform_3, window_bounds = array<i64: 1, 32>}, {pipeline_mode = #tpu.pipeline_mode<synchronous>, transform_indices = @transform_4, window_bounds = array<i64: 1, 32>}, {pipeline_mode = #tpu.pipeline_mode<synchronous>, transform_indices = @transform_5, window_bounds = array<i64: 1, 16>}, {pipeline_mode = #tpu.pipeline_mode<synchronous>, transform_indices = @transform_6, window_bounds = array<i64: 1, 16>}, {pipeline_mode = #tpu.pipeline_mode<synchronous>, transform_indices = @transform_7, window_bounds = array<i64: 32, 32>}, {pipeline_mode = #tpu.pipeline_mode<synchronous>, transform_indices = @transform_8, window_bounds = array<i64: 16, 32>}, {pipeline_mode = #tpu.pipeline_mode<synchronous>, transform_indices = @transform_9, window_bounds = array<i64: 1, 32>}, {pipeline_mode = #tpu.pipeline_mode<synchronous>, transform_indices = @transform_10, window_bounds = array<i64: 32, 32>}, {pipeline_mode = #tpu.pipeline_mode<synchronous>, transform_indices = @transform_11, window_bounds = array<i64: 32, 32>}, {pipeline_mode = #tpu.pipeline_mode<synchronous>, transform_indices = @transform_12, window_bounds = array<i64: 32, 32>}, {pipeline_mode = #tpu.pipeline_mode<synchronous>, transform_indices = @transform_13, window_bounds = array<i64: 1, 32>}, {pipeline_mode = #tpu.pipeline_mode<synchronous>, transform_indices = @transform_14, window_bounds = array<i64: 32, 48>}, {transform_indices = @transform_15, window_bounds = array<i64: 32, 32>}, {transform_indices = @transform_16, window_bounds = array<i64: 32, 32>}]} {
    %c0 = arith.constant 0 : index
    %c0_0 = arith.constant 0 : index
    %0 = vector.load %arg1[%c0, %c0_0] : memref<32x32xf32, #tpu.memory_space<vmem>>, vector<32x32xf32>
    %c0_1 = arith.constant 0 : index
    %c0_2 = arith.constant 0 : index
    %1 = vector.load %arg2[%c0_1, %c0_2] : memref<32x16xf32, #tpu.memory_space<vmem>>, vector<32x16xf32>
    %c0_3 = arith.constant 0 : index
    %c0_4 = arith.constant 0 : index
    %2 = vector.load %arg4[%c0_3, %c0_4] : memref<1x32xf32, #tpu.memory_space<vmem>>, vector<1x32xf32>
    %3 = vector.broadcast %2 : vector<1x32xf32> to vector<32x32xf32>
    %4 = arith.mulf %0, %3 : vector<32x32xf32>
    %c0_5 = arith.constant 0 : index
    %c0_6 = arith.constant 0 : index
    %5 = vector.load %arg5[%c0_5, %c0_6] : memref<1x32xf32, #tpu.memory_space<vmem>>, vector<1x32xf32>
    %6 = vector.broadcast %5 : vector<1x32xf32> to vector<32x32xf32>
    %7 = arith.addf %4, %6 : vector<32x32xf32>
    %cst = arith.constant 0.000000e+00 : f32
    %8 = vector.broadcast %cst : f32 to vector<32x32xf32>
    %9 = arith.maximumf %7, %8 : vector<32x32xf32>
    %c0_7 = arith.constant 0 : index
    %c0_8 = arith.constant 0 : index
    %10 = vector.load %arg6[%c0_7, %c0_8] : memref<1x16xf32, #tpu.memory_space<vmem>>, vector<1x16xf32>
    %11 = vector.broadcast %10 : vector<1x16xf32> to vector<32x16xf32>
    %12 = arith.mulf %1, %11 : vector<32x16xf32>
    %c0_9 = arith.constant 0 : index
    %c0_10 = arith.constant 0 : index
    %13 = vector.load %arg7[%c0_9, %c0_10] : memref<1x16xf32, #tpu.memory_space<vmem>>, vector<1x16xf32>
    %14 = vector.broadcast %13 : vector<1x16xf32> to vector<32x16xf32>
    %15 = arith.addf %12, %14 : vector<32x16xf32>
    %cst_11 = arith.constant 0.000000e+00 : f32
    %16 = vector.broadcast %cst_11 : f32 to vector<32x16xf32>
    %17 = arith.maximumf %15, %16 : vector<32x16xf32>
    %18 = arith.truncf %9 : vector<32x32xf32> to vector<32x32xbf16>
    %c0_12 = arith.constant 0 : index
    %c0_13 = arith.constant 0 : index
    %19 = vector.load %arg8[%c0_12, %c0_13] : memref<32x32xbf16, #tpu.memory_space<vmem>>, vector<32x32xbf16>
    %cst_14 = arith.constant dense<0.000000e+00> : vector<32x32xf32>
    %20 = tpu.matmul %18, %19, %cst_14 {dimension_numbers = #tpu.dot_dimension_numbers<[1], [0], [0], [1], [0, 0, 1, 1], [], []>} : vector<32x32xbf16>, vector<32x32xbf16>, vector<32x32xf32> -> vector<32x32xf32>
    %21 = arith.truncf %17 : vector<32x16xf32> to vector<32x16xbf16>
    %c0_15 = arith.constant 0 : index
    %c0_16 = arith.constant 0 : index
    %22 = vector.load %arg9[%c0_15, %c0_16] : memref<16x32xbf16, #tpu.memory_space<vmem>>, vector<16x32xbf16>
    %cst_17 = arith.constant dense<0.000000e+00> : vector<32x32xf32>
    %23 = tpu.matmul %21, %22, %cst_17 {dimension_numbers = #tpu.dot_dimension_numbers<[1], [0], [0], [1], [0, 0, 1, 1], [], []>} : vector<32x16xbf16>, vector<16x32xbf16>, vector<32x32xf32> -> vector<32x32xf32>
    %24 = arith.addf %20, %23 : vector<32x32xf32>
    %c0_18 = arith.constant 0 : index
    %c0_19 = arith.constant 0 : index
    %25 = vector.load %arg10[%c0_18, %c0_19] : memref<1x32xf32, #tpu.memory_space<vmem>>, vector<1x32xf32>
    %26 = vector.broadcast %25 : vector<1x32xf32> to vector<32x32xf32>
    %27 = arith.addf %24, %26 : vector<32x32xf32>
    %cst_20 = arith.constant 0.000000e+00 : f32
    %28 = vector.broadcast %cst_20 : f32 to vector<32x32xf32>
    %29 = arith.maximumf %27, %28 : vector<32x32xf32>
    %c0_21 = arith.constant 0 : index
    %c0_22 = arith.constant 0 : index
    %30 = vector.load %arg3[%c0_21, %c0_22] : memref<32x2xf32, #tpu.memory_space<vmem>>, vector<32x1xf32>
    %c0_23 = arith.constant 0 : index
    %c1 = arith.constant 1 : index
    %31 = vector.load %arg3[%c0_23, %c1] : memref<32x2xf32, #tpu.memory_space<vmem>>, vector<32x1xf32>
    %c1_i32 = arith.constant 1 : i32
    %32 = tpu.dynamic_rotate %29 by %c1_i32 dim 0 : vector<32x32xf32>, i32 -> vector<32x32xf32>
    %33 = vector.broadcast %30 : vector<32x1xf32> to vector<32x32xf32>
    %34 = arith.mulf %32, %33 : vector<32x32xf32>
    %c31_i32 = arith.constant 31 : i32
    %35 = tpu.dynamic_rotate %29 by %c31_i32 dim 0 : vector<32x32xf32>, i32 -> vector<32x32xf32>
    %36 = vector.broadcast %31 : vector<32x1xf32> to vector<32x32xf32>
    %37 = arith.mulf %35, %36 : vector<32x32xf32>
    %38 = arith.truncf %29 : vector<32x32xf32> to vector<32x32xbf16>
    %c0_24 = arith.constant 0 : index
    %c0_25 = arith.constant 0 : index
    %39 = vector.load %arg12[%c0_24, %c0_25] : memref<32x32xbf16, #tpu.memory_space<vmem>>, vector<32x32xbf16>
    %cst_26 = arith.constant dense<0.000000e+00> : vector<32x32xf32>
    %40 = tpu.matmul %38, %39, %cst_26 {dimension_numbers = #tpu.dot_dimension_numbers<[1], [0], [0], [1], [0, 0, 1, 1], [], []>} : vector<32x32xbf16>, vector<32x32xbf16>, vector<32x32xf32> -> vector<32x32xf32>
    %41 = arith.truncf %34 : vector<32x32xf32> to vector<32x32xbf16>
    %c0_27 = arith.constant 0 : index
    %c0_28 = arith.constant 0 : index
    %42 = vector.load %arg11[%c0_27, %c0_28] : memref<32x32xbf16, #tpu.memory_space<vmem>>, vector<32x32xbf16>
    %cst_29 = arith.constant dense<0.000000e+00> : vector<32x32xf32>
    %43 = tpu.matmul %41, %42, %cst_29 {dimension_numbers = #tpu.dot_dimension_numbers<[1], [0], [0], [1], [0, 0, 1, 1], [], []>} : vector<32x32xbf16>, vector<32x32xbf16>, vector<32x32xf32> -> vector<32x32xf32>
    %44 = arith.addf %40, %43 : vector<32x32xf32>
    %45 = arith.truncf %37 : vector<32x32xf32> to vector<32x32xbf16>
    %c0_30 = arith.constant 0 : index
    %c0_31 = arith.constant 0 : index
    %46 = vector.load %arg13[%c0_30, %c0_31] : memref<32x32xbf16, #tpu.memory_space<vmem>>, vector<32x32xbf16>
    %cst_32 = arith.constant dense<0.000000e+00> : vector<32x32xf32>
    %47 = tpu.matmul %45, %46, %cst_32 {dimension_numbers = #tpu.dot_dimension_numbers<[1], [0], [0], [1], [0, 0, 1, 1], [], []>} : vector<32x32xbf16>, vector<32x32xbf16>, vector<32x32xf32> -> vector<32x32xf32>
    %48 = arith.addf %44, %47 : vector<32x32xf32>
    %c0_33 = arith.constant 0 : index
    %c0_34 = arith.constant 0 : index
    %49 = vector.load %arg14[%c0_33, %c0_34] : memref<1x32xf32, #tpu.memory_space<vmem>>, vector<1x32xf32>
    %50 = vector.broadcast %49 : vector<1x32xf32> to vector<32x32xf32>
    %51 = arith.addf %48, %50 : vector<32x32xf32>
    %cst_35 = arith.constant 0.000000e+00 : f32
    %52 = vector.broadcast %cst_35 : f32 to vector<32x32xf32>
    %53 = arith.maximumf %51, %52 : vector<32x32xf32>
    %54 = arith.truncf %53 : vector<32x32xf32> to vector<32x32xbf16>
    %c0_36 = arith.constant 0 : index
    %c0_37 = arith.constant 0 : index
    %55 = vector.load %arg15[%c0_36, %c0_37] : memref<32x48xbf16, #tpu.memory_space<vmem>>, vector<32x48xbf16>
    %cst_38 = arith.constant dense<0.000000e+00> : vector<32x48xf32>
    %56 = tpu.matmul %54, %55, %cst_38 {dimension_numbers = #tpu.dot_dimension_numbers<[1], [0], [0], [1], [0, 0, 1, 1], [], []>} : vector<32x32xbf16>, vector<32x48xbf16>, vector<32x48xf32> -> vector<32x48xf32>
    %57 = vector.extract_strided_slice %56 {offsets = [0, 0], sizes = [32, 32], strides = [1, 1]} : vector<32x48xf32> to vector<32x32xf32>
    %58 = vector.extract_strided_slice %56 {offsets = [0, 32], sizes = [32, 16], strides = [1, 1]} : vector<32x48xf32> to vector<32x16xf32>
    %59 = arith.addf %0, %57 : vector<32x32xf32>
    %c0_39 = arith.constant 0 : index
    %c0_40 = arith.constant 0 : index
    %60 = vector.load %arg16[%c0_39, %c0_40] : memref<32x32xf32, #tpu.memory_space<vmem>>, vector<32x32xf32>
    tpu.vector_store %arg16[%c0_39, %c0_40], %59 {strides = array<i32>} : memref<32x32xf32, #tpu.memory_space<vmem>>, vector<32x32xf32>,
    %c0_41 = arith.constant 0 : index
    %c0_42 = arith.constant 0 : index
    %61 = vector.load %arg17[%c0_41, %c0_42] : memref<32x32xf32, #tpu.memory_space<vmem>>, vector<32x16xf32>
    tpu.vector_store %arg17[%c0_41, %c0_42], %1 {strides = array<i32>} : memref<32x32xf32, #tpu.memory_space<vmem>>, vector<32x16xf32>,
    %c0_43 = arith.constant 0 : index
    %c16 = arith.constant 16 : index
    %62 = vector.load %arg17[%c0_43, %c16] : memref<32x32xf32, #tpu.memory_space<vmem>>, vector<32x16xf32>
    tpu.vector_store %arg17[%c0_43, %c16], %58 {strides = array<i32>} : memref<32x32xf32, #tpu.memory_space<vmem>>, vector<32x16xf32>,
    return
  }
  func.func @transform_0(%arg0: i32) -> (i32, i32) {
    %c0_i32 = arith.constant 0 : i32
    %c0_i32_0 = arith.constant 0 : i32
    return %arg0, %c0_i32 : i32, i32
  }
  func.func @transform_1(%arg0: i32) -> (i32, i32) {
    %c0_i32 = arith.constant 0 : i32
    %c0_i32_0 = arith.constant 0 : i32
    return %arg0, %c0_i32 : i32, i32
  }
  func.func @transform_2(%arg0: i32) -> (i32, i32) {
    %c0_i32 = arith.constant 0 : i32
    %c0_i32_0 = arith.constant 0 : i32
    %c0_i32_1 = arith.constant 0 : i32
    return %c0_i32, %c0_i32_0 : i32, i32
  }
  func.func @transform_3(%arg0: i32) -> (i32, i32) {
    %c0_i32 = arith.constant 0 : i32
    %c0_i32_0 = arith.constant 0 : i32
    %c0_i32_1 = arith.constant 0 : i32
    return %c0_i32, %c0_i32_0 : i32, i32
  }
  func.func @transform_4(%arg0: i32) -> (i32, i32) {
    %c0_i32 = arith.constant 0 : i32
    %c0_i32_0 = arith.constant 0 : i32
    %c0_i32_1 = arith.constant 0 : i32
    return %c0_i32, %c0_i32_0 : i32, i32
  }
  func.func @transform_5(%arg0: i32) -> (i32, i32) {
    %c0_i32 = arith.constant 0 : i32
    %c0_i32_0 = arith.constant 0 : i32
    %c0_i32_1 = arith.constant 0 : i32
    return %c0_i32, %c0_i32_0 : i32, i32
  }
  func.func @transform_6(%arg0: i32) -> (i32, i32) {
    %c0_i32 = arith.constant 0 : i32
    %c0_i32_0 = arith.constant 0 : i32
    %c0_i32_1 = arith.constant 0 : i32
    return %c0_i32, %c0_i32_0 : i32, i32
  }
  func.func @transform_7(%arg0: i32) -> (i32, i32) {
    %c0_i32 = arith.constant 0 : i32
    %c0_i32_0 = arith.constant 0 : i32
    %c0_i32_1 = arith.constant 0 : i32
    return %c0_i32, %c0_i32_0 : i32, i32
  }
  func.func @transform_8(%arg0: i32) -> (i32, i32) {
    %c0_i32 = arith.constant 0 : i32
    %c0_i32_0 = arith.constant 0 : i32
    %c0_i32_1 = arith.constant 0 : i32
    return %c0_i32, %c0_i32_0 : i32, i32
  }
  func.func @transform_9(%arg0: i32) -> (i32, i32) {
    %c0_i32 = arith.constant 0 : i32
    %c0_i32_0 = arith.constant 0 : i32
    %c0_i32_1 = arith.constant 0 : i32
    return %c0_i32, %c0_i32_0 : i32, i32
  }
  func.func @transform_10(%arg0: i32) -> (i32, i32) {
    %c0_i32 = arith.constant 0 : i32
    %c0_i32_0 = arith.constant 0 : i32
    %c0_i32_1 = arith.constant 0 : i32
    return %c0_i32, %c0_i32_0 : i32, i32
  }
  func.func @transform_11(%arg0: i32) -> (i32, i32) {
    %c0_i32 = arith.constant 0 : i32
    %c0_i32_0 = arith.constant 0 : i32
    %c0_i32_1 = arith.constant 0 : i32
    return %c0_i32, %c0_i32_0 : i32, i32
  }
  func.func @transform_12(%arg0: i32) -> (i32, i32) {
    %c0_i32 = arith.constant 0 : i32
    %c0_i32_0 = arith.constant 0 : i32
    %c0_i32_1 = arith.constant 0 : i32
    return %c0_i32, %c0_i32_0 : i32, i32
  }
  func.func @transform_13(%arg0: i32) -> (i32, i32) {
    %c0_i32 = arith.constant 0 : i32
    %c0_i32_0 = arith.constant 0 : i32
    %c0_i32_1 = arith.constant 0 : i32
    return %c0_i32, %c0_i32_0 : i32, i32
  }
  func.func @transform_14(%arg0: i32) -> (i32, i32) {
    %c0_i32 = arith.constant 0 : i32
    %c0_i32_0 = arith.constant 0 : i32
    %c0_i32_1 = arith.constant 0 : i32
    return %c0_i32, %c0_i32_0 : i32, i32
  }
  func.func @transform_15(%arg0: i32) -> (i32, i32) {
    %c0_i32 = arith.constant 0 : i32
    %c0_i32_0 = arith.constant 0 : i32
    return %arg0, %c0_i32 : i32, i32
  }
  func.func @transform_16(%arg0: i32) -> (i32, i32) {
    %c0_i32 = arith.constant 0 : i32
    %c0_i32_0 = arith.constant 0 : i32
    return %arg0, %c0_i32 : i32, i32
  }
}

</mosaic_0001>

<bundles_post_ra>
// kernel: tpu_custom_call.1
= control target key start
LH: loop header
LB: loop body
LE: loop exit
PB: predicated region body
PF: predicated region fallthrough
CT: control target
= control target key end

     0   :  { %s1538_s21 = smov 0   ;;  %s1692_s0 = inlined_call_operand.vmem [shape: f32[128,32], index: 0, kind: input, shape index: {}]   ;;  %s1693_s1 = inlined_call_operand.vmem [shape: f32[128,16], index: 1, kind: input, shape index: {}]   ;;  %s1694_s2 = inlined_call_operand.vmem [shape: f32[32,2], index: 2, kind: input, shape index: {}]   ;;  %s1695_s3 = inlined_call_operand.vmem [shape: f32[1,32], index: 3, kind: input, shape index: {}]   ;;  %s1696_s4 = inlined_call_operand.vmem [shape: f32[1,32], index: 4, kind: input, shape index: {}]   ;;  %s1697_s5 = inlined_call_operand.vmem [shape: f32[1,16], index: 5, kind: input, shape index: {}]   ;;  %s1698_s6 = inlined_call_operand.vmem [shape: f32[1,16], index: 6, kind: input, shape index: {}]   ;;  %s1699_s7 = inlined_call_operand.vmem [shape: bf16[32,32], index: 7, kind: input, shape index: {}]   ;;  %s1700_s8 = inlined_call_operand.vmem [shape: bf16[16,32], index: 8, kind: input, shape index: {}]   ;;  %s1701_s9 = inlined_call_operand.vmem [shape: f32[1,32], index: 9, kind: input, shape index: {}]   ;;  %s1702_s10 = inlined_call_operand.vmem [shape: bf16[32,32], index: 10, kind: input, shape index: {}]   ;;  %s1703_s11 = inlined_call_operand.vmem [shape: bf16[32,32], index: 11, kind: input, shape index: {}]   ;;  %s1704_s12 = inlined_call_operand.vmem [shape: bf16[32,32], index: 12, kind: input, shape index: {}]   ;;  %s1705_s13 = inlined_call_operand.vmem [shape: f32[1,32], index: 13, kind: input, shape index: {}]   ;;  %s1706_s14 = inlined_call_operand.vmem [shape: bf16[32,48], index: 14, kind: input, shape index: {}]   ;;  %s1707_s15 = inlined_call_operand.vmem [shape: f32[128,32], index: 15, kind: output, shape index: {0}]   ;;  %s1708_s16 = inlined_call_operand.vmem [shape: f32[128,32], index: 16, kind: output, shape index: {1}]  }
   0x1   :  { %1709 = sst [smem:[#allocation2_spill]] %s1692_s0 }
   0x2 LB: > { %s1291_s22 = sadd.s32 4294967295, %s1448_s21   ;;  %p1295_p0 = scmp.ge.s32.totalorder %s1448_s21, 1  ;;  %s1448_s21 = sphi %s1538_s21, %s27_s21  }
   0x3   : > { %p477_p1 = scmp.lt.s32.totalorder %s1448_s21, 5 }
   0x5   : > { %p478_p2 = pnand %p1295_p0, %p477_p1 }
   0x6   : > { %v1431_v0 = vld [vmem:[%s1700_s8] sm:$0xff] (!%p478_p2)   ;;  %s1296_s25 = sshll.u32 (!%p478_p2), %s1291_s22, 2  ;;  %v1561_v3 = vld [vmem:[%s1694_s2 + $0x10] sm:$0xff] (!%p478_p2)  ;;  %v1450_v6 = vmov (!%p478_p2), 0   ;;  %v780_v8 = vld [vmem:[%s1694_s2 + $0x18] sm:$0xff] (!%p478_p2)  ;;  %vm638_vm0 = vcmask (!%p478_p2), 130048   ;;  %v785_v56 = vlaneseq (!%p478_p2) }
   0x7   : > { %481 = sbr.rel (%p478_p2) target bundleno = 848 (0x350), region = 80  ;;  %p538_p3 = scmp.lt.s32.totalorder (!%p478_p2), %s1296_s25, 15  ;;  %1358 = vmatprep.subr.bf16.mxu0 (!%p478_p2), %v1431_v0  ;;  %v1552_v1 = vld [vmem:[%s1699_s7] sm:$0xff] (!%p478_p2)   ;;  %1428 = vset.pattern.permute.xlu1 (!%p478_p2), %v1450_v6  ;;  %v778_v10 = vld [vmem:[%s1694_s2 + $0x8] sm:$0xff] (!%p478_p2)  ;;  %v1451_v40 = vmov (!%p478_p2), 1   ;;  %vm706_vm1 = vcmask (!%p478_p2), 261120  }
   0x8   : > { %1359 = vmatpush3.bf16.msra.mxu0 (!%p478_p2), %v1431_v0  ;;  %v1306_v2 = vld [vmem:[%s1697_s5] ss:$0 sm:$0xff] (!%p478_p2)  ;;  %1427 = vset.pattern.permute.xlu0 (!%p478_p2), %v1450_v6  ;;  %s1710_s26 = sld [smem:[#allocation2_spill]] (!%p478_p2)  ;;  %v1433_v42 = vld [vmem:[%s1699_s7 + $0x8] sm:$0xff] (!%p478_p2)   ;;  %v786_v62 = vshrl.u32 (!%p478_p2), %v785_v56, 7  ;;  %vm1184_vm4 = vcmask (!%p478_p2), 261248  }
   0x9   : > { %1364 = vmatprep.subr.bf16.mxu0 (!%p478_p2), %v1552_v1  ;;  %v1307_v4 = vld [vmem:[%s1698_s6] ss:$0 sm:$0xff] (!%p478_p2)  ;;  %804 = vperm.xlu1 (!%p478_p2), %1428, %v1561_v3   ;;  %v1435_v50 = vld [vmem:[%s1702_s10 + $0x8] sm:$0xff] (!%p478_p2)  }
   0xa   : > { %v1304_v5 = vld [vmem:[%s1695_s3] ss:$0 sm:$0xff] (!%p478_p2)  ;;  %vm820_vm2 = vcmp.lt.s32.totalorder (!%p478_p2), %v786_v62, 7  ;;  %vm787_vm3 = vcmp.lt.s32.totalorder (!%p478_p2), %v786_v62, 1 }
   0xb   : > { %v777_v7 = vld [vmem:[%s1694_s2] sm:$0xff] (!%p478_p2) }
   0xc   : > { %v1305_v9 = vld [vmem:[%s1696_s4] ss:$0 sm:$0xff] (!%p478_p2)  ;;  %794 = vperm.xlu0 (!%p478_p2), %1427, %v777_v7  }
   0xd   : > { %809 = vperm.xlu1 (!%p478_p2), %1428, %v780_v8   ;;  %v1434_v49 = vld [vmem:[%s1702_s10] sm:$0xff] (!%p478_p2)  }
   0xe   : > { %s1712_s25 = smov (!%p538_p3, %s1296_s25), 15  ;;  %1372 = vmatprep.subr.bf16.mxu1 %v1434_v49  ;;  %v1436_v51 = vld [vmem:[%s1703_s11] sm:$0xff]  }
   0xf   : > { %s1563_s17 = sshll.u32 %s1712_s25, 3  ;;  %1373 = vmatpush3.bf16.msra.mxu1 %v1434_v49  ;;  %v1315_v57 = vld [vmem:[%s1701_s9] ss:$0 sm:$0xff]  ;;  %v1441_v49 = vld [vmem:[%s1706_s14 + $0x8] sm:$0xff]  }
  0x10   : > { %s547_s29 = scalar_lea.vmem %s1693_s1, %s1563_s17  ;;  %s1585_s18 = scalar_lea.vmem %s1708_s16, %s1563_s17  ;;  %799 = vperm.xlu0 %1427, %v778_v10   ;;  %1374 = vmatprep.subr.bf16.mxu1 %v1435_v50 }
  0x11   : > { %v566_v11 = vld [vmem:[%s547_s29] sm:$0xff]  ;;  %v567_v12 = vld [vmem:[%s547_s29 + $0x8] sm:$0xff]  ;;  %v568_v13 = vld [vmem:[%s547_s29 + $0x10] sm:$0xff]  ;;  %s541_s27 = scalar_lea.vmem %s1710_s26, %s1563_s17  ;;  %1430 = vset.pattern.permute.xlu1 %v1451_v40  ;;  %s553_s28 = scalar_lea.vmem %s1707_s15, %s1563_s17 }
  0x12   : > { %v603_v14 = vmul.f32 %v1306_v2, %v566_v11  ;;  %v604_v15 = vmul.f32 %v1306_v2, %v567_v12  ;;  %1164 = vst.msk [vmem:[%s1585_s18] sm:$0xff] %vm638_vm0, %v566_v11  ;;  %1165 = vst.msk [vmem:[%s1585_s18 + $0x8] sm:$0xff] %vm638_vm0, %v567_v12  ;;  %v569_v16 = vld [vmem:[%s547_s29 + $0x18] sm:$0xff]  ;;  %v605_v17 = vmul.f32 %v1306_v2, %v568_v13  ;;  %v1604_v18 = vld [vmem:[%s541_s27] sm:$0xff]  ;;  %830 = vperm.xlu1 %1430, %v778_v10   ;;  %s1452_s29 = smov 112  }
  0x13   : > { %1166 = vst.msk [vmem:[%s1585_s18 + $0x10] sm:$0xff] %vm638_vm0, %v568_v13  ;;  %v1606_v19 = vld [vmem:[%s541_s27 + $0x8] sm:$0xff]  ;;  %v606_v20 = vmul.f32 %v1306_v2, %v569_v16  ;;  %1167 = vst.msk [vmem:[%s1585_s18 + $0x18] sm:$0xff] %vm638_vm0, %v569_v16  ;;  %v577_v21 = vmul.f32 %v1304_v5, %v1604_v18  ;;  %v1612_v23 = vld [vmem:[%s541_s27 + $0x10] sm:$0xff]  ;;  %1375 = vmatpush3.bf16.msra.mxu1 %v1435_v50 }
  0x14   : > { %v578_v22 = vmul.f32 %v1304_v5, %v1606_v19  ;;  %v1614_v24 = vld [vmem:[%s541_s27 + $0x18] sm:$0xff]  ;;  %v614_v25 = vadd.f32 %v1307_v4, %v603_v14  ;;  %v615_v26 = vadd.f32 %v1307_v4, %v604_v15  ;;  %v616_v27 = vadd.f32 %v1307_v4, %v605_v17  ;;  %1429 = vset.pattern.permute.xlu0 %v1451_v40  ;;  %v1328_v50 = vld [vmem:[%s1705_s13] ss:$0 sm:$0xff] }
  0x15   : > { %v617_v28 = vadd.f32 %v1307_v4, %v606_v20  ;;  %v588_v29 = vadd.f32 %v1305_v9, %v577_v21  ;;  %v579_v34 = vmul.f32 %v1304_v5, %v1612_v23  ;;  %v580_v38 = vmul.f32 %v1304_v5, %v1614_v24  ;;  %826 = vperm.xlu0 %1429, %v777_v7  }
  0x16   : > { %v589_v30 = vadd.f32 %v1305_v9, %v578_v22  ;;  %v618_v31 = vmax.f32 %v614_v25, 0.0  ;;  %v619_v32 = vmax.f32 %v615_v26, 0.0  ;;  %v620_v33 = vmax.f32 %v616_v27, 0.0  ;;  %834 = vperm.xlu1 %1430, %v1561_v3   ;;  %1380 = vmatprep.subr.bf16.mxu1 %v1436_v51 }
  0x17   : > { %v621_v35 = vmax.f32 %v617_v28, 0.0  ;;  %v592_v36 = vmax.f32 %v588_v29, 0.0  ;;  %v590_v44 = vadd.f32 %v1305_v9, %v579_v34  ;;  %v591_v45 = vadd.f32 %v1305_v9, %v580_v38 }
  0x18   : > { %v593_v37 = vmax.f32 %v589_v30, 0.0  ;;  %v628_v39 = vpack.c.bf16 %v619_v32, %v618_v31 }
  0x19   : > { %v629_v41 = vpack.c.bf16 %v621_v35, %v620_v33  ;;  %838 = vperm.xlu0 %1429, %v780_v8   ;;  %v594_v46 = vmax.f32 %v590_v44, 0.0  ;;  %v595_v47 = vmax.f32 %v591_v45, 0.0  ;;  %v1437_v45 = vld [vmem:[%s1703_s11 + $0x8] sm:$0xff]  }
  0x1a   : > { %v622_v43 = vpack.c.bf16 %v593_v37, %v592_v36  ;;  %1360 = vmatprep.mubr.msk.bf16.mxu0 %vm638_vm0, %v628_v39 }
  0x1b   : > { %1361 = vmatmul.mubr.msk.bf16.vlgmr.msra.gmra.mrb[0].mxu0 %vm638_vm0, %v629_v41  ;;  %v623_v48 = vpack.c.bf16 %v595_v47, %v594_v46  ;;  %v1438_v46 = vld [vmem:[%s1704_s12] sm:$0xff]   ;;  %v1439_v47 = vld [vmem:[%s1704_s12 + $0x8] sm:$0xff]  }
  0x1c   : > { %1365 = vmatpush3.bf16.msra.mxu0 %v1552_v1  ;;  %1368 = vmatprep.mubr.msk.bf16.mxu0 %vm706_vm1, %v622_v43 }
  0x1d   : > { %1366 = vmatprep.subr.bf16.mxu0 %v1433_v42 }
  0x20   : > { %1367 = vmatpush3.bf16.msra.mxu0 %v1433_v42 }
  0x27   : > { %1369 = vmatmul.mubr.msk.bf16.vlgmr.msra.gmra.mrb[0].mxu0 %vm706_vm1, %v623_v48  ;;  %v1440_v48 = vld [vmem:[%s1706_s14] sm:$0xff]  }
  0x28   : > { %1396 = vmatprep.subr.bf16.mxu0 %v1440_v48 }
  0x29   : > { %1397 = vmatpush3.bf16.msra.mxu0 %v1440_v48 }
  0x2a   : > { %1398 = vmatprep.subr.bf16.mxu0 %v1441_v49 }
  0x2d   : > { %1399 = vmatpush3.bf16.msra.mxu0 %v1441_v49 }
  0x88   : > { %v805_v52 = vpop.permute.xlu1 %804 }
  0x8b   : > { %v795_v53 = vpop.permute.xlu0 %794 }
  0x8c   : > { %v810_v54 = vpop.permute.xlu1 %809 }
  0x8f   : > { %v800_v55 = vpop.permute.xlu0 %799 }
  0x91   : > { %v831_v59 = vpop.permute.xlu1 %830 }
  0x94   : > { %v827_v63 = vpop.permute.xlu0 %826 }
  0x95   : > { %v835_v16 = vpop.permute.xlu1 %834 }
  0x98   : > { %v839_v17 = vpop.permute.xlu0 %838 }
  0xfa   : > { %v1370_v58 = vpop.f32.mrb[0].mxu0 }
  0xfb   : > { %v771_v60 = vadd.f32 %v1370_v58, %v1315_v57  ;;  %v747_v61 = vpop.f32.mrb[1].mxu0 }
  0xfc   : > { %v769_v0 = vadd.f32 %v1315_v57, %v747_v61  ;;  %v1371_v1 = vpop.f32.mrb[2].mxu0 }
  0xfd   : > { %v775_v2 = vmax.f32 %v771_v60, 0.0  ;;  %v772_v3 = vadd.f32 %v1371_v1, %v1315_v57  ;;  %v750_v4 = vpop.f32.mrb[3].mxu0 }
  0xfe   : > { %v773_v5 = vmax.f32 %v769_v0, 0.0  ;;  %v770_v6 = vadd.f32 %v1315_v57, %v750_v4 }
  0xff   : > { %v776_v7 = vmax.f32 %v772_v3, 0.0  ;;  %v783_v8 = vrot.slane %v775_v2, 7  ;;  %v818_v12 = vrot.slane %v775_v2, 1 }
 0x100   : > { %v781_v9 = vrot.slane %v773_v5, 7  ;;  %v816_v10 = vrot.slane %v773_v5, 1  ;;  %v774_v11 = vmax.f32 %v770_v6, 0.0 }
 0x101   : > { %v784_v13 = vrot.slane %v776_v7, 7  ;;  %v819_v14 = vrot.slane %v776_v7, 1  ;;  %v846_v15 = vpack.c.bf16 %v776_v7, %v775_v2 }
 0x102   : > { %v782_v20 = vrot.slane %v774_v11, 7  ;;  %v817_v21 = vrot.slane %v774_v11, 1  ;;  %v845_v22 = vpack.c.bf16 %v774_v11, %v773_v5 }
 0x103   : > { %v821_v25 = vsel %vm820_vm2, %v818_v12, %v819_v14  ;;  %v824_v26 = vsel %vm820_vm2, %v819_v14, %v816_v10  ;;  %v791_v27 = vsel %vm787_vm3, %v784_v13, %v781_v9  ;;  %v788_v28 = vsel %vm787_vm3, %v783_v8, %v784_v13 }
 0x104   : > { %v822_v29 = vsel %vm820_vm2, %v817_v21, %v818_v12  ;;  %v823_v30 = vsel %vm820_vm2, %v816_v10, %v817_v21  ;;  %v843_v31 = vmul.f32 %v835_v16, %v821_v25  ;;  %v844_v32 = vmul.f32 %v839_v17, %v824_v26 }
 0x105   : > { %v842_v33 = vmul.f32 %v831_v59, %v822_v29  ;;  %v841_v34 = vmul.f32 %v827_v63, %v823_v30  ;;  %v790_v35 = vsel %vm787_vm3, %v781_v9, %v782_v20  ;;  %v812_v36 = vmul.f32 %v795_v53, %v791_v27 }
 0x106   : > { %v992_v37 = vpack.c.bf16 %v844_v32, %v843_v31  ;;  %v813_v38 = vmul.f32 %v800_v55, %v790_v35  ;;  %v789_v39 = vsel %vm787_vm3, %v782_v20, %v783_v8  ;;  %v815_v40 = vmul.f32 %v810_v54, %v788_v28 }
 0x107   : > { %v991_v41 = vpack.c.bf16 %v842_v33, %v841_v34  ;;  %v814_v42 = vmul.f32 %v805_v52, %v789_v39 }
 0x108   : > { %v851_v43 = vpack.c.bf16 %v813_v38, %v812_v36 }
 0x109   : > { %v852_v44 = vpack.c.bf16 %v815_v40, %v814_v42 }
 0x10a   : > { %1376 = vmatprep.mubr.msk.bf16.mxu1 %vm706_vm1, %v851_v43 }
 0x10b   : > { %1377 = vmatmul.mubr.msk.bf16.vlgmr.msra.gmra.mrb[0].mxu1 %vm706_vm1, %v852_v44 }
 0x10c   : > { %1381 = vmatpush3.bf16.msra.mxu1 %v1436_v51  ;;  %1384 = vmatprep.mubr.msk.bf16.mxu1 %vm706_vm1, %v845_v22 }
 0x10d   : > { %1382 = vmatprep.subr.bf16.mxu1 %v1437_v45 }
 0x110   : > { %1383 = vmatpush3.bf16.msra.mxu1 %v1437_v45 }
 0x111   : > { %1388 = vmatprep.subr.bf16.mxu1 %v1438_v46 }
 0x117   : > { %1385 = vmatmul.mubr.msk.bf16.vlgmr.msra.gmra.mrb[0].mxu1 %vm706_vm1, %v846_v15 }
 0x118   : > { %1389 = vmatpush3.bf16.msra.mxu1 %v1438_v46  ;;  %1392 = vmatprep.mubr.msk.bf16.mxu1 %vm706_vm1, %v991_v41 }
 0x119   : > { %1390 = vmatprep.subr.bf16.mxu1 %v1439_v47 }
 0x11c   : > { %1391 = vmatpush3.bf16.msra.mxu1 %v1439_v47 }
 0x123   : > { %1393 = vmatmul.mubr.msk.bf16.vlgmr.msra.gmra.mrb[0].mxu1 %vm706_vm1, %v992_v37 }
 0x1f6   : > { %v1394_v51 = vpop.f32.mrb[0].mxu1 }
 0x1f7   : > { %v1077_v52 = vadd.f32 %v1394_v51, %v1328_v50  ;;  %v1049_v53 = vpop.f32.mrb[1].mxu1 }
 0x1f8   : > { %v1075_v54 = vadd.f32 %v1328_v50, %v1049_v53  ;;  %v1395_v55 = vpop.f32.mrb[2].mxu1 }
 0x1f9   : > { %v1078_v56 = vadd.f32 %v1395_v55, %v1328_v50  ;;  %v1052_v57 = vpop.f32.mrb[3].mxu1  ;;  %v1081_v59 = vmax.f32 %v1077_v52, 0.0 }
 0x1fa   : > { %v1076_v58 = vadd.f32 %v1328_v50, %v1052_v57  ;;  %v1079_v61 = vmax.f32 %v1075_v54, 0.0 }
 0x1fb   : > { %v1082_v60 = vmax.f32 %v1078_v56, 0.0 }
 0x1fc   : > { %v1080_v62 = vmax.f32 %v1076_v58, 0.0 }
 0x1fd   : > { %v1084_v63 = vpack.c.bf16 %v1082_v60, %v1081_v59 }
 0x1fe   : > { %v1083_v0 = vpack.c.bf16 %v1080_v62, %v1079_v61 }
 0x200   : > { %1400 = vmatprep.mubr.msk.bf16.mxu0 %vm706_vm1, %v1083_v0 }
 0x201   : > { %1401 = vmatmul.mubr.msk.bf16.vlgmr.msra.gmra.mrb[4].mxu0 %vm706_vm1, %v1084_v63 }
 0x2d4   : > { %v1402_v1 = vpop.f32.mrb[4].mxu0 }
 0x2d5   : > { %v1158_v2 = vadd.f32 %v1402_v1, %v1612_v23  ;;  %v1141_v3 = vpop.f32.mrb[5].mxu0 }
 0x2d6   : > { %v1156_v4 = vadd.f32 %v1141_v3, %v1604_v18  ;;  %1172 = vrot.lane.b32.xlu1 %v1141_v3, %s1452_s29  ;;  %v1403_v5 = vpop.f32.mrb[6].mxu0 }
 0x2d7   : > { %1162 = vst.msk [vmem:[%s553_s28 + $0x10] sm:$0xff] %vm706_vm1, %v1158_v2  ;;  %v1159_v6 = vadd.f32 %v1403_v5, %v1614_v24  ;;  %v1144_v7 = vpop.f32.mrb[7].mxu0 }
 0x2d8   : > { %1160 = vst.msk [vmem:[%s553_s28] sm:$0xff] %vm706_vm1, %v1156_v4  ;;  %v1157_v8 = vadd.f32 %v1144_v7, %v1606_v19  ;;  %1174 = vrot.lane.b32.xlu0 %v1144_v7, %s1452_s29 }
 0x2d9   : > { %1163 = vst.msk [vmem:[%s553_s28 + $0x18] sm:$0xff] %vm706_vm1, %v1159_v6 }
 0x2da   : > { %1161 = vst.msk [vmem:[%s553_s28 + $0x8] sm:$0xff] %vm706_vm1, %v1157_v8  ;;  %1176 = vrot.lane.b32.xlu1 %v1402_v1, %s1452_s29 }
 0x2dc   : > { %1178 = vrot.lane.b32.xlu0 %v1403_v5, %s1452_s29 }
 0x348   : > { %v1173_v18 = vpop.permute.xlu1 %1172 }
 0x349   : > { %1185 = vst.msk [vmem:[%s1585_s18] sm:$0xff] %vm1184_vm4, %v1173_v18 }
 0x34a   : > { %v1175_v23 = vpop.permute.xlu0 %1174 }
 0x34b   : > { %1186 = vst.msk [vmem:[%s1585_s18 + $0x8] sm:$0xff] %vm1184_vm4, %v1175_v23 }
 0x34c   : > { %v1177_v9 = vpop.permute.xlu1 %1176 }
 0x34d   : > { %1187 = vst.msk [vmem:[%s1585_s18 + $0x10] sm:$0xff] %vm1184_vm4, %v1177_v9 }
 0x34e   : > { %v1179_v24 = vpop.permute.xlu0 %1178 }
 0x34f   : > { %1188 = vst.msk [vmem:[%s1585_s18 + $0x18] sm:$0xff] %vm1184_vm4, %v1179_v24 }
 0x350 PF: > { %s27_s21 = sadd.s32 1, %s1448_s21  }
 0x351   : > { %p24_p4 = scmp.ge.s32.totalorder %s27_s21, 6  }
 0x353   :  { %26 = sbr.rel (!%p24_p4) target bundleno = 2 (0x2), region = 125 }

</bundles_post_ra>
